<compile_context>
chip_gen: v6e
topology: v6e:2x2x1
jax: 0.10.0
libtpu: 0.0.40
codegen_flags: <defaults>
</compile_context>

<pallas_src>
import jax
import jax.numpy as jnp
from jax.experimental import pallas as pl
from jax.experimental.pallas import tpu as pltpu

NEG_INF = -1e30  # masks padded softmax lanes: exp(NEG_INF - m) == 0


def policy_mlp_kernel(x_ref, w1_ref, b1_ref, w2_ref, b2_ref,
                      w3_ref, b3_ref, w4_ref, b4_ref, o_ref):
    x = x_ref[...]                                              # (TB, 8)  K padded 6->8

    # fc1 + relu
    h = jnp.dot(x, w1_ref[...], preferred_element_type=jnp.float32) + b1_ref[...]
    h = jnp.maximum(h, 0.0)                                     # (TB, 128)

    # fc2 + tanh
    h = jnp.dot(h, w2_ref[...], preferred_element_type=jnp.float32) + b2_ref[...]
    h = jnp.tanh(h)                                             # (TB, 128)

    # fc3 + relu (N padded 64->128 with zero weights/bias -> padded lanes stay 0)
    h = jnp.dot(h, w3_ref[...], preferred_element_type=jnp.float32) + b3_ref[...]
    h = jnp.maximum(h, 0.0)                                     # (TB, 128)

    # fc4 + softmax over a lane-dense 128-wide tile.  Padded K rows of w4 are
    # zero (they meet h's zero lanes), padded N lanes have zero weights and
    # bias = NEG_INF, so after the max-subtraction they exp() to exactly 0 and
    # drop out of the denominator.
    logits = jnp.dot(h, w4_ref[...], preferred_element_type=jnp.float32) + b4_ref[...]
    m = jnp.max(logits, axis=-1, keepdims=True)
    e = jnp.exp(logits - m)                                     # (TB, 128)
    denom = jnp.sum(e, axis=-1, keepdims=True)
    # EUP approximate reciprocal + one Newton-Raphson refinement: the divide
    # leaves the VPU slot, accuracy back to ~1 ulp f32.
    r = pl.reciprocal(denom, approx=True)
    r = r * (2.0 - denom * r)
    o_ref[...] = e * r                                          # (TB, 128) unmasked full-lane vst


def _round_up(n, m):
    return ((n + m - 1) // m) * m


def policy_network_forward(x, params, *, block_rows=512):
    """x: (B, 6) float32.  params = (w1,b1,w2,b2,w3,b3,w4,b4), weights stored as
    (in_features, out_features), biases as (1, out_features)."""
    (w1, b1, w2, b2, w3, b3, w4, b4) = params
    B = x.shape[0]

    # Row tile: multiple of 8 sublanes; big batches are chunked at `block_rows`
    # rows per grid step so the x/out streams pipeline against resident weights.
    TB = min(block_rows, _round_up(B, 8))
    B_pad = _round_up(B, TB)
    n_blocks = B_pad // TB

    # One-time layout massaging outside the kernel:
    #   x/w1 padded K: 6 -> 8
    #   w3/b3 padded N: 64 -> 128 (zeros)
    #   w4 padded K: 64 -> 128 (zeros) and N: 3 -> 128 (zeros); b4 pad = NEG_INF
    x_pad = jnp.pad(x.astype(jnp.float32), ((0, B_pad - B), (0, 8 - x.shape[1])))
    w1_pad = jnp.pad(w1, ((0, 8 - w1.shape[0]), (0, 0)))
    w3_pad = jnp.pad(w3, ((0, 0), (0, 128 - w3.shape[1])))
    b3_pad = jnp.pad(b3, ((0, 0), (0, 128 - b3.shape[1])))
    w4_pad = jnp.pad(w4, ((0, 128 - w4.shape[0]), (0, 128 - w4.shape[1])))
    b4_pad = jnp.pad(b4, ((0, 0), (0, 128 - b4.shape[1])), constant_values=NEG_INF)

    # TODO(synk): for large-batch v6e/v7x deployments store weights in bfloat16
    # (keep preferred_element_type=f32) to halve weight DMA and double MXU rate.

    def weight_spec(shape):
        # Constant index_map -> same block every grid step -> weights stay resident.
        return pl.BlockSpec(shape, lambda i: (0, 0))

    flops = 2 * B_pad * (8 * 128 + 128 * 128 + 128 * 128 + 128 * 128)
    transcendentals = B_pad * (128 + 128 + 1)                   # tanh + exp + recip
    bytes_accessed = 4 * (
        x_pad.size + w1_pad.size + b1.size + w2.size + b2.size
        + w3_pad.size + b3_pad.size + w4_pad.size + b4_pad.size + B_pad * 128
    )

    out = pl.pallas_call(
        policy_mlp_kernel,
        out_shape=jax.ShapeDtypeStruct((B_pad, 128), jnp.float32),
        grid=(n_blocks,),
        in_specs=[
            pl.BlockSpec((TB, 8), lambda i: (i, 0)),            # x: tiled over rows
            weight_spec((8, 128)),                              # w1 (K padded)
            weight_spec((1, 128)),                              # b1
            weight_spec((128, 128)),                            # w2
            weight_spec((1, 128)),                              # b2
            weight_spec((128, 128)),                            # w3 (N padded to 128)
            weight_spec((1, 128)),                              # b3 (padded lanes = 0)
            weight_spec((128, 128)),                            # w4 (K and N padded to 128)
            weight_spec((1, 128)),                              # b4 (padded lanes = NEG_INF)
        ],
        out_specs=pl.BlockSpec((TB, 128), lambda i: (i, 0)),
        compiler_params=pltpu.CompilerParams(
            dimension_semantics=("parallel",),                  # batch axis -> v7x 2nd TC
        ),
        cost_estimate=pl.CostEstimate(
            flops=flops,
            transcendentals=transcendentals,
            bytes_accessed=bytes_accessed,
        ),
    )(x_pad, w1_pad, b1, w2, b2, w3_pad, b3_pad, w4_pad, b4_pad)

    return out[:B, :3]


def init_params(key):
    """PyTorch nn.Linear-style init (U[-1/sqrt(in), 1/sqrt(in)]),
    weights stored as (in_features, out_features), biases as (1, out_features)."""
    dims = [(6, 128), (128, 128), (128, 64), (64, 3)]
    params = []
    for (fan_in, fan_out) in dims:
        key, kw, kb = jax.random.split(key, 3)
        bound = 1.0 / (fan_in ** 0.5)
        w = jax.random.uniform(kw, (fan_in, fan_out), jnp.float32, -bound, bound)
        b = jax.random.uniform(kb, (1, fan_out), jnp.float32, -bound, bound)
        params += [w, b]
    return tuple(params)


def reference_forward(x, params):
    (w1, b1, w2, b2, w3, b3, w4, b4) = params
    h = jnp.maximum(x @ w1 + b1, 0.0)
    h = jnp.tanh(h @ w2 + b2)
    h = jnp.maximum(h @ w3 + b3, 0.0)
    return jax.nn.softmax(h @ w4 + b4, axis=-1)


if __name__ == "__main__":
    key = jax.random.PRNGKey(0)
    key, kx, kx2 = jax.random.split(key, 3)
    params = init_params(key)

    # Small-shape check (single grid step, B padded only on sublanes).
    B = 8
    x = jax.random.normal(kx, (B, 6), jnp.float32)
    out = jax.block_until_ready(policy_network_forward(x, params))
    ref = reference_forward(x, params)
    assert out.shape == (B, 3)
    assert jnp.allclose(out, ref, atol=1e-5, rtol=1e-5)
    assert jnp.allclose(jnp.sum(out, axis=-1), jnp.ones((B,)), atol=1e-5)

    # Multi-step grid + ragged-batch check (exercises row tiling, resident
    # weights, and the padded-row / padded-lane slicing path).
    B2 = 1000
    x2 = jax.random.normal(kx2, (B2, 6), jnp.float32)
    out2 = jax.block_until_ready(policy_network_forward(x2, params, block_rows=256))
    ref2 = reference_forward(x2, params)
    assert out2.shape == (B2, 3)
    assert jnp.allclose(out2, ref2, atol=1e-5, rtol=1e-5)
    assert jnp.allclose(jnp.sum(out2, axis=-1), jnp.ones((B2,)), atol=1e-5)

    print("KERNEL_OK")
</pallas_src>

<mosaic_0001>
module attributes {stable_mosaic.version = 11 : i64} {
  func.func @policy_mlp_kernel(%arg0: i32, %arg1: memref<8x8xf32, #tpu.memory_space<vmem>>, %arg2: memref<8x128xf32, #tpu.memory_space<vmem>>, %arg3: memref<1x128xf32, #tpu.memory_space<vmem>>, %arg4: memref<128x128xf32, #tpu.memory_space<vmem>>, %arg5: memref<1x128xf32, #tpu.memory_space<vmem>>, %arg6: memref<128x128xf32, #tpu.memory_space<vmem>>, %arg7: memref<1x128xf32, #tpu.memory_space<vmem>>, %arg8: memref<128x128xf32, #tpu.memory_space<vmem>>, %arg9: memref<1x128xf32, #tpu.memory_space<vmem>>, %arg10: memref<8x128xf32, #tpu.memory_space<vmem>>) attributes {dimension_semantics = [#tpu.dimension_semantics<parallel>], iteration_bounds = array<i64: 1>, scalar_prefetch = 0 : i64, scratch_operands = 0 : i64, tpu.core_type = #tpu.core_type<tc>, window_params = [{transform_indices = @transform_0, window_bounds = array<i64: 8, 8>}, {pipeline_mode = #tpu.pipeline_mode<synchronous>, transform_indices = @transform_1, window_bounds = array<i64: 8, 128>}, {pipeline_mode = #tpu.pipeline_mode<synchronous>, transform_indices = @transform_2, window_bounds = array<i64: 1, 128>}, {pipeline_mode = #tpu.pipeline_mode<synchronous>, transform_indices = @transform_3, window_bounds = array<i64: 128, 128>}, {pipeline_mode = #tpu.pipeline_mode<synchronous>, transform_indices = @transform_4, window_bounds = array<i64: 1, 128>}, {pipeline_mode = #tpu.pipeline_mode<synchronous>, transform_indices = @transform_5, window_bounds = array<i64: 128, 128>}, {pipeline_mode = #tpu.pipeline_mode<synchronous>, transform_indices = @transform_6, window_bounds = array<i64: 1, 128>}, {pipeline_mode = #tpu.pipeline_mode<synchronous>, transform_indices = @transform_7, window_bounds = array<i64: 128, 128>}, {pipeline_mode = #tpu.pipeline_mode<synchronous>, transform_indices = @transform_8, window_bounds = array<i64: 1, 128>}, {transform_indices = @transform_9, window_bounds = array<i64: 8, 128>}]} {
    %c0 = arith.constant 0 : index
    %c0_0 = arith.constant 0 : index
    %0 = vector.load %arg1[%c0, %c0_0] : memref<8x8xf32, #tpu.memory_space<vmem>>, vector<8x8xf32>
    %c0_1 = arith.constant 0 : index
    %c0_2 = arith.constant 0 : index
    %1 = vector.load %arg2[%c0_1, %c0_2] : memref<8x128xf32, #tpu.memory_space<vmem>>, vector<8x128xf32>
    %cst = arith.constant dense<0.000000e+00> : vector<8x128xf32>
    %2 = tpu.matmul %0, %1, %cst {dimension_numbers = #tpu.dot_dimension_numbers<[1], [0], [0], [1], [0, 0, 1, 1], [], []>} : vector<8x8xf32>, vector<8x128xf32>, vector<8x128xf32> -> vector<8x128xf32>
    %c0_3 = arith.constant 0 : index
    %c0_4 = arith.constant 0 : index
    %3 = vector.load %arg3[%c0_3, %c0_4] : memref<1x128xf32, #tpu.memory_space<vmem>>, vector<1x128xf32>
    %4 = vector.broadcast %3 : vector<1x128xf32> to vector<8x128xf32>
    %5 = arith.addf %2, %4 : vector<8x128xf32>
    %cst_5 = arith.constant 0.000000e+00 : f32
    %6 = vector.broadcast %cst_5 : f32 to vector<8x128xf32>
    %7 = arith.maximumf %5, %6 : vector<8x128xf32>
    %c0_6 = arith.constant 0 : index
    %c0_7 = arith.constant 0 : index
    %8 = vector.load %arg4[%c0_6, %c0_7] : memref<128x128xf32, #tpu.memory_space<vmem>>, vector<128x128xf32>
    %cst_8 = arith.constant dense<0.000000e+00> : vector<8x128xf32>
    %9 = tpu.matmul %7, %8, %cst_8 {dimension_numbers = #tpu.dot_dimension_numbers<[1], [0], [0], [1], [0, 0, 1, 1], [], []>} : vector<8x128xf32>, vector<128x128xf32>, vector<8x128xf32> -> vector<8x128xf32>
    %c0_9 = arith.constant 0 : index
    %c0_10 = arith.constant 0 : index
    %10 = vector.load %arg5[%c0_9, %c0_10] : memref<1x128xf32, #tpu.memory_space<vmem>>, vector<1x128xf32>
    %11 = vector.broadcast %10 : vector<1x128xf32> to vector<8x128xf32>
    %12 = arith.addf %9, %11 : vector<8x128xf32>
    %13 = math.tanh %12 : vector<8x128xf32>
    %c0_11 = arith.constant 0 : index
    %c0_12 = arith.constant 0 : index
    %14 = vector.load %arg6[%c0_11, %c0_12] : memref<128x128xf32, #tpu.memory_space<vmem>>, vector<128x128xf32>
    %cst_13 = arith.constant dense<0.000000e+00> : vector<8x128xf32>
    %15 = tpu.matmul %13, %14, %cst_13 {dimension_numbers = #tpu.dot_dimension_numbers<[1], [0], [0], [1], [0, 0, 1, 1], [], []>} : vector<8x128xf32>, vector<128x128xf32>, vector<8x128xf32> -> vector<8x128xf32>
    %c0_14 = arith.constant 0 : index
    %c0_15 = arith.constant 0 : index
    %16 = vector.load %arg7[%c0_14, %c0_15] : memref<1x128xf32, #tpu.memory_space<vmem>>, vector<1x128xf32>
    %17 = vector.broadcast %16 : vector<1x128xf32> to vector<8x128xf32>
    %18 = arith.addf %15, %17 : vector<8x128xf32>
    %cst_16 = arith.constant 0.000000e+00 : f32
    %19 = vector.broadcast %cst_16 : f32 to vector<8x128xf32>
    %20 = arith.maximumf %18, %19 : vector<8x128xf32>
    %c0_17 = arith.constant 0 : index
    %c0_18 = arith.constant 0 : index
    %21 = vector.load %arg8[%c0_17, %c0_18] : memref<128x128xf32, #tpu.memory_space<vmem>>, vector<128x128xf32>
    %cst_19 = arith.constant dense<0.000000e+00> : vector<8x128xf32>
    %22 = tpu.matmul %20, %21, %cst_19 {dimension_numbers = #tpu.dot_dimension_numbers<[1], [0], [0], [1], [0, 0, 1, 1], [], []>} : vector<8x128xf32>, vector<128x128xf32>, vector<8x128xf32> -> vector<8x128xf32>
    %c0_20 = arith.constant 0 : index
    %c0_21 = arith.constant 0 : index
    %23 = vector.load %arg9[%c0_20, %c0_21] : memref<1x128xf32, #tpu.memory_space<vmem>>, vector<1x128xf32>
    %24 = vector.broadcast %23 : vector<1x128xf32> to vector<8x128xf32>
    %25 = arith.addf %22, %24 : vector<8x128xf32>
    %cst_22 = arith.constant dense<0xFF800000> : vector<8xf32>
    %26 = vector.multi_reduction <maximumf>, %25, %cst_22 [1] : vector<8x128xf32> to vector<8xf32>
    %27 = vector.shape_cast %26 : vector<8xf32> to vector<8x1xf32>
    %28 = vector.broadcast %27 : vector<8x1xf32> to vector<8x128xf32>
    %29 = arith.subf %25, %28 : vector<8x128xf32>
    %30 = math.exp %29 : vector<8x128xf32>
    %cst_23 = arith.constant dense<0.000000e+00> : vector<8xf32>
    %31 = vector.multi_reduction <add>, %30, %cst_23 [1] : vector<8x128xf32> to vector<8xf32>
    %32 = vector.shape_cast %31 : vector<8xf32> to vector<8x1xf32>
    %33 = tpu.reciprocal %32 {approx = true} : vector<8x1xf32> -> vector<8x1xf32>
    %34 = arith.mulf %32, %33 : vector<8x1xf32>
    %cst_24 = arith.constant 2.000000e+00 : f32
    %35 = vector.broadcast %cst_24 : f32 to vector<8x1xf32>
    %36 = arith.subf %35, %34 : vector<8x1xf32>
    %37 = arith.mulf %33, %36 : vector<8x1xf32>
    %38 = vector.broadcast %37 : vector<8x1xf32> to vector<8x128xf32>
    %39 = arith.mulf %30, %38 : vector<8x128xf32>
    %c0_25 = arith.constant 0 : index
    %c0_26 = arith.constant 0 : index
    %40 = vector.load %arg10[%c0_25, %c0_26] : memref<8x128xf32, #tpu.memory_space<vmem>>, vector<8x128xf32>
    tpu.vector_store %arg10[%c0_25, %c0_26], %39 {strides = array<i32>} : memref<8x128xf32, #tpu.memory_space<vmem>>, vector<8x128xf32>,
    return
  }
  func.func @transform_0(%arg0: i32) -> (i32, i32) {
    %c0_i32 = arith.constant 0 : i32
    %c0_i32_0 = arith.constant 0 : i32
    return %arg0, %c0_i32 : i32, i32
  }
  func.func @transform_1(%arg0: i32) -> (i32, i32) {
    %c0_i32 = arith.constant 0 : i32
    %c0_i32_0 = arith.constant 0 : i32
    %c0_i32_1 = arith.constant 0 : i32
    return %c0_i32, %c0_i32_0 : i32, i32
  }
  func.func @transform_2(%arg0: i32) -> (i32, i32) {
    %c0_i32 = arith.constant 0 : i32
    %c0_i32_0 = arith.constant 0 : i32
    %c0_i32_1 = arith.constant 0 : i32
    return %c0_i32, %c0_i32_0 : i32, i32
  }
  func.func @transform_3(%arg0: i32) -> (i32, i32) {
    %c0_i32 = arith.constant 0 : i32
    %c0_i32_0 = arith.constant 0 : i32
    %c0_i32_1 = arith.constant 0 : i32
    return %c0_i32, %c0_i32_0 : i32, i32
  }
  func.func @transform_4(%arg0: i32) -> (i32, i32) {
    %c0_i32 = arith.constant 0 : i32
    %c0_i32_0 = arith.constant 0 : i32
    %c0_i32_1 = arith.constant 0 : i32
    return %c0_i32, %c0_i32_0 : i32, i32
  }
  func.func @transform_5(%arg0: i32) -> (i32, i32) {
    %c0_i32 = arith.constant 0 : i32
    %c0_i32_0 = arith.constant 0 : i32
    %c0_i32_1 = arith.constant 0 : i32
    return %c0_i32, %c0_i32_0 : i32, i32
  }
  func.func @transform_6(%arg0: i32) -> (i32, i32) {
    %c0_i32 = arith.constant 0 : i32
    %c0_i32_0 = arith.constant 0 : i32
    %c0_i32_1 = arith.constant 0 : i32
    return %c0_i32, %c0_i32_0 : i32, i32
  }
  func.func @transform_7(%arg0: i32) -> (i32, i32) {
    %c0_i32 = arith.constant 0 : i32
    %c0_i32_0 = arith.constant 0 : i32
    %c0_i32_1 = arith.constant 0 : i32
    return %c0_i32, %c0_i32_0 : i32, i32
  }
  func.func @transform_8(%arg0: i32) -> (i32, i32) {
    %c0_i32 = arith.constant 0 : i32
    %c0_i32_0 = arith.constant 0 : i32
    %c0_i32_1 = arith.constant 0 : i32
    return %c0_i32, %c0_i32_0 : i32, i32
  }
  func.func @transform_9(%arg0: i32) -> (i32, i32) {
    %c0_i32 = arith.constant 0 : i32
    %c0_i32_0 = arith.constant 0 : i32
    return %arg0, %c0_i32 : i32, i32
  }
}

</mosaic_0001>

<bundles_post_ra>
// kernel: tpu_custom_call.1
= control target key start
LH: loop header
LB: loop body
LE: loop exit
PB: predicated region body
PF: predicated region fallthrough
CT: control target
= control target key end

     0   :  { %14 = vsyncpa [#allocation3], 0  ;;  %s960_s0 = inlined_call_operand.hbm [shape: f32[8,8], index: 0, kind: input, shape index: {}]   ;;  %s961_s1 = inlined_call_operand.hbm [shape: f32[8,128], index: 1, kind: input, shape index: {}]   ;;  %s962_s2 = inlined_call_operand.vmem [shape: f32[1,128], index: 2, kind: input, shape index: {}]   ;;  %s963_s3 = inlined_call_operand.hbm [shape: f32[128,128], index: 3, kind: input, shape index: {}]   ;;  %s964_s4 = inlined_call_operand.vmem [shape: f32[1,128], index: 4, kind: input, shape index: {}]   ;;  %s965_s5 = inlined_call_operand.hbm [shape: f32[128,128], index: 5, kind: input, shape index: {}]   ;;  %s966_s6 = inlined_call_operand.vmem [shape: f32[1,128], index: 6, kind: input, shape index: {}]   ;;  %s967_s7 = inlined_call_operand.hbm [shape: f32[128,128], index: 7, kind: input, shape index: {}]   ;;  %s968_s8 = inlined_call_operand.vmem [shape: f32[1,128], index: 8, kind: input, shape index: {}]   ;;  %s969_s9 = inlined_call_operand.hbm [shape: f32[8,128], index: 9, kind: output, shape index: {}]  }
   0x1   :  { %15 = vsyncpa [#allocation6], 0 }
   0x2   :  { %16 = vsyncpa [#allocation9], 0 }
   0x3   :  { %17 = vsyncpa [#allocation4], 0  ;;  %s804_s30 = smov [#allocation5]  }
   0x4   :  { %s34_s10 = sshll.u32 %s804_s30, 4  ;;  %s35_s10 = int_to_ptr.vmem [resolvable:$true] %s34_s10 }
   0x5   :  { %s684_s11 = scalar_lea.vmem %s35_s10, 128  ;;  %p689_p1 = scmp.lt.s32.totalorder %s35_s10, %s35_s10 }
   0x6   :  { %p685_p0 = scmp.ne.s32.totalorder %s35_s10, %s684_s11  ;;  %p690_p2 = scmp.lt.s32.totalorder %s684_s11, %s684_s11 }
   0x8   :  { %p691_p3 = por %p690_p2, %p689_p1 }
   0xa   :  { %p692_p4 = pnand %p691_p3, %p685_p0 }
   0xc   :  { %695 = shalt.err (!%p692_p4)
}
   0xd   :  { %37 = dma.hbm_to_vmem [thread:$0]  %s961_s1, 128, %s35_s10, [#allocation6]  }
   0xe   :  { %s805_s14 = smov [#allocation8]   ;;  %s806_s16 = smov [#allocation2]  }
   0xf   :  { %s59_s15 = sshll.u32 %s805_s14, 4  ;;  %s24_s17 = sshll.u32 %s806_s16, 4  ;;  %s60_s15 = int_to_ptr.vmem [resolvable:$true] %s59_s15  ;;  %s25_s17 = int_to_ptr.vmem [resolvable:$true] %s24_s17 }
  0x10   :  { %s704_s18 = scalar_lea.vmem %s60_s15, 2048  ;;  %p709_p6 = scmp.lt.s32.totalorder %s60_s15, %s60_s15 }
  0x11   :  { %p705_p5 = scmp.ne.s32.totalorder %s60_s15, %s704_s18  ;;  %p710_p7 = scmp.lt.s32.totalorder %s704_s18, %s704_s18 }
  0x13   :  { %p711_p8 = por %p710_p7, %p709_p6 }
  0x15   :  { %p712_p9 = pnand %p711_p8, %p705_p5 }
  0x17   :  { %715 = shalt.err (!%p712_p9)
}
  0x18   :  { %s807_s19 = smov 128   ;;  %s808_s20 = smov 8  }
  0x19   :  { %65 = dma.hbm_to_vmem [thread:$0]  %s965_s5, 2048, %s60_s15, [#allocation9], %s807_s19, %s807_s19, %s808_s20  }
  0x1a   :  { %s724_s1 = scalar_lea.vmem %s25_s17, 128  ;;  %p729_p11 = scmp.lt.s32.totalorder %s25_s17, %s25_s17 }
  0x1b   :  { %p725_p10 = scmp.ne.s32.totalorder %s25_s17, %s724_s1  ;;  %p730_p12 = scmp.lt.s32.totalorder %s724_s1, %s724_s1 }
  0x1d   :  { %p731_p13 = por %p730_p12, %p729_p11 }
  0x1f   :  { %p732_p0 = pnand %p731_p13, %p725_p10 }
  0x21   :  { %735 = shalt.err (!%p732_p0)
}
  0x22   :  { %27 = dma.hbm_to_vmem [thread:$0]  %s960_s0, 128, %s25_s17, [#allocation3]  }
  0x23   :  { %s809_s25 = smov [#allocation7]   ;;  %s810_s27 = smov [#allocation10]  }
  0x24   :  { %s45_s26 = sshll.u32 %s809_s25, 4  ;;  %s73_s28 = sshll.u32 %s810_s27, 4  ;;  %s46_s26 = int_to_ptr.vmem [resolvable:$true] %s45_s26  ;;  %s74_s28 = int_to_ptr.vmem [resolvable:$true] %s73_s28 }
  0x25   :  { %s744_s29 = scalar_lea.vmem %s46_s26, 2048  ;;  %p749_p2 = scmp.lt.s32.totalorder %s46_s26, %s46_s26 }
  0x26   :  { %p745_p1 = scmp.ne.s32.totalorder %s46_s26, %s744_s29  ;;  %p750_p3 = scmp.lt.s32.totalorder %s744_s29, %s744_s29 }
  0x28   :  { %p751_p4 = por %p750_p3, %p749_p2 }
  0x2a   :  { %p752_p5 = pnand %p751_p4, %p745_p1 }
  0x2c   :  { %755 = shalt.err (!%p752_p5)
}
  0x2d   :  { %51 = dma.hbm_to_vmem [thread:$0]  %s963_s3, 2048, %s46_s26, [#allocation6], %s807_s19, %s807_s19, %s808_s20  }
  0x2e   :  { %s764_s0 = scalar_lea.vmem %s74_s28, 2048  ;;  %p769_p7 = scmp.lt.s32.totalorder %s74_s28, %s74_s28 }
  0x2f   :  { %p765_p6 = scmp.ne.s32.totalorder %s74_s28, %s764_s0  ;;  %p770_p8 = scmp.lt.s32.totalorder %s764_s0, %s764_s0 }
  0x31   :  { %p771_p9 = por %p770_p8, %p769_p7 }
  0x33   :  { %p772_p10 = pnand %p771_p9, %p765_p6 }
  0x35   :  { %775 = shalt.err (!%p772_p10)
}
  0x36   :  { %79 = dma.hbm_to_vmem [thread:$0]  %s967_s7, 2048, %s74_s28, [#allocation9], %s807_s19, %s807_s19, %s808_s20  }
  0x37   :  { %796 = dma.done.wait [#allocation3], 128  }
  0x38   :  { %797 = vsyncadd [#allocation3], 4294967168 }
  0x39   :  { %798 = dma.done.wait [#allocation6], 2176  }
  0x3a   :  { %799 = vsyncadd [#allocation6], 4294965120 }
  0x3b   :  { %800 = dma.done.wait [#allocation9], 4096  }
  0x3c   :  { %801 = vsyncadd [#allocation9], 4294963200  ;;  %v811_v0 = vmov 0.0   ;;  %vm812_vm0 = vmmov 0   ;;  %vm106_vm1 = vcmask 64512   ;;  %v98_v1 = vld [vmem:[#allocation5] sm:$0xff] }
  0x3d   :  { %550 = vmatprep.subr.mxu0 %v811_v0  ;;  %552 = vmatprep.mubr.msk.f32.mxu0 %vm812_vm0, %v811_v0  ;;  %v97_v2 = vld [vmem:[#allocation2] sm:$0xff]  ;;  %v196_v3 = vld [vmem:[#allocation7 + $0x78] sm:$0xff]  ;;  %v194_v5 = vld [vmem:[#allocation7 + $0x68] sm:$0xff] }
  0x3e   :  { %555 = vmatprep.subr.mxu1 %v811_v0  ;;  %587 = vmatprep.mubr.msk.f32.mxu1 %vm812_vm0, %v811_v0  ;;  %v195_v4 = vld [vmem:[#allocation7 + $0x70] sm:$0xff]  ;;  %v193_v6 = vld [vmem:[#allocation7 + $0x60] sm:$0xff]  ;;  %v192_v7 = vld [vmem:[#allocation7 + $0x58] sm:$0xff] }
  0x3f   :  { %551 = vmatpush3.msra.mxu0 %v98_v1  ;;  %556 = vmatpush3.msra.mxu1 %v196_v3  ;;  %v191_v8 = vld [vmem:[#allocation7 + $0x50] sm:$0xff]  ;;  %v190_v9 = vld [vmem:[#allocation7 + $0x48] sm:$0xff]  ;;  %v189_v10 = vld [vmem:[#allocation7 + $0x40] sm:$0xff] }
  0x40   :  { %553 = vmatmul.mubr.msk.f32.vlgmr.msra.gmra.mxu0 %vm106_vm1, %v97_v2  ;;  %557 = vmatprep.subr.mxu1 %v811_v0  ;;  %v188_v11 = vld [vmem:[#allocation7 + $0x38] sm:$0xff]  ;;  %v187_v12 = vld [vmem:[#allocation7 + $0x30] sm:$0xff]  ;;  %v186_v13 = vld [vmem:[#allocation7 + $0x28] sm:$0xff] }
  0x41   :  { %558 = vmatpush3.msra.mxu1 %v195_v4  ;;  %590 = vmatprep.subr.mxu0 %v811_v0  ;;  %v185_v14 = vld [vmem:[#allocation7 + $0x20] sm:$0xff]  ;;  %v184_v15 = vld [vmem:[#allocation7 + $0x18] sm:$0xff]  ;;  %v183_v16 = vld [vmem:[#allocation7 + $0x10] sm:$0xff] }
  0x42   :  { %559 = vmatprep.subr.mxu1 %v811_v0  ;;  %622 = vmatprep.mubr.msk.f32.mxu0 %vm812_vm0, %v811_v0  ;;  %v182_v17 = vld [vmem:[#allocation7 + $0x8] sm:$0xff]  ;;  %v181_v18 = vld [vmem:[#allocation7] sm:$0xff]  ;;  %v290_v19 = vld [vmem:[#allocation8 + $0x78] sm:$0xff] }
  0x43   :  { %560 = vmatpush3.msra.mxu1 %v194_v5  ;;  %v289_v20 = vld [vmem:[#allocation8 + $0x70] sm:$0xff]  ;;  %591 = vmatpush3.msra.mxu0 %v290_v19  ;;  %v288_v21 = vld [vmem:[#allocation8 + $0x68] sm:$0xff]  ;;  %v287_v22 = vld [vmem:[#allocation8 + $0x60] sm:$0xff] }
  0x44   :  { %561 = vmatprep.subr.mxu1 %v811_v0  ;;  %592 = vmatprep.subr.mxu0 %v811_v0  ;;  %v286_v23 = vld [vmem:[#allocation8 + $0x58] sm:$0xff]  ;;  %v285_v24 = vld [vmem:[#allocation8 + $0x50] sm:$0xff]  ;;  %v284_v25 = vld [vmem:[#allocation8 + $0x48] sm:$0xff] }
  0x45   :  { %562 = vmatpush3.msra.mxu1 %v193_v6  ;;  %593 = vmatpush3.msra.mxu0 %v289_v20  ;;  %v492_v26 = vld [vmem:[%s962_s2] ss:$0 sm:$0xff]  ;;  %v283_v31 = vld [vmem:[#allocation8 + $0x40] sm:$0xff]  ;;  %v282_v32 = vld [vmem:[#allocation8 + $0x38] sm:$0xff] }
  0x46   :  { %563 = vmatprep.subr.mxu1 %v811_v0  ;;  %594 = vmatprep.subr.mxu0 %v811_v0  ;;  %v281_v33 = vld [vmem:[#allocation8 + $0x30] sm:$0xff]  ;;  %v280_v34 = vld [vmem:[#allocation8 + $0x28] sm:$0xff]  ;;  %v279_v35 = vld [vmem:[#allocation8 + $0x20] sm:$0xff] }
  0x47   :  { %564 = vmatpush3.msra.mxu1 %v192_v7  ;;  %595 = vmatpush3.msra.mxu0 %v288_v21  ;;  %v278_v36 = vld [vmem:[#allocation8 + $0x18] sm:$0xff]  ;;  %v277_v37 = vld [vmem:[#allocation8 + $0x10] sm:$0xff]  ;;  %v276_v38 = vld [vmem:[#allocation8 + $0x8] sm:$0xff] }
  0x48   :  { %565 = vmatprep.subr.mxu1 %v811_v0  ;;  %596 = vmatprep.subr.mxu0 %v811_v0  ;;  %v275_v39 = vld [vmem:[#allocation8] sm:$0xff]  ;;  %v384_v40 = vld [vmem:[#allocation10 + $0x78] sm:$0xff]  ;;  %v383_v41 = vld [vmem:[#allocation10 + $0x70] sm:$0xff] }
  0x49   :  { %566 = vmatpush3.msra.mxu1 %v191_v8  ;;  %597 = vmatpush3.msra.mxu0 %v287_v22  ;;  %v382_v42 = vld [vmem:[#allocation10 + $0x68] sm:$0xff]  ;;  %v381_v43 = vld [vmem:[#allocation10 + $0x60] sm:$0xff]  ;;  %v380_v44 = vld [vmem:[#allocation10 + $0x58] sm:$0xff] }
  0x4a   :  { %567 = vmatprep.subr.mxu1 %v811_v0  ;;  %598 = vmatprep.subr.mxu0 %v811_v0  ;;  %v379_v45 = vld [vmem:[#allocation10 + $0x50] sm:$0xff]  ;;  %v378_v46 = vld [vmem:[#allocation10 + $0x48] sm:$0xff]  ;;  %v377_v47 = vld [vmem:[#allocation10 + $0x40] sm:$0xff] }
  0x4b   :  { %568 = vmatpush3.msra.mxu1 %v190_v9  ;;  %599 = vmatpush3.msra.mxu0 %v286_v23  ;;  %v376_v48 = vld [vmem:[#allocation10 + $0x38] sm:$0xff]  ;;  %v375_v49 = vld [vmem:[#allocation10 + $0x30] sm:$0xff]  ;;  %v374_v50 = vld [vmem:[#allocation10 + $0x28] sm:$0xff] }
  0x4c   :  { %569 = vmatprep.subr.mxu1 %v811_v0  ;;  %600 = vmatprep.subr.mxu0 %v811_v0  ;;  %v373_v51 = vld [vmem:[#allocation10 + $0x20] sm:$0xff]  ;;  %v372_v52 = vld [vmem:[#allocation10 + $0x18] sm:$0xff]  ;;  %v494_v53 = vld [vmem:[%s964_s4] ss:$0 sm:$0xff] }
  0x4d   :  { %570 = vmatpush3.msra.mxu1 %v189_v10  ;;  %601 = vmatpush3.msra.mxu0 %v285_v24  ;;  %v371_v58 = vld [vmem:[#allocation10 + $0x10] sm:$0xff]  ;;  %v370_v59 = vld [vmem:[#allocation10 + $0x8] sm:$0xff]  ;;  %v369_v60 = vld [vmem:[#allocation10] sm:$0xff] }
  0x4e   :  { %571 = vmatprep.subr.mxu1 %v811_v0  ;;  %602 = vmatprep.subr.mxu0 %v811_v0  ;;  %v495_v61 = vld [vmem:[%s966_s6] ss:$0 sm:$0xff]  ;;  %s813_s6 = smov [#allocation11]  }
  0x4f   :  { %572 = vmatpush3.msra.mxu1 %v188_v11  ;;  %603 = vmatpush3.msra.mxu0 %v284_v25  ;;  %v496_v3 = vld [vmem:[%s968_s8] ss:$0 sm:$0xff]  ;;  %s481_s16 = sshll.u32 %s813_s6, 4  ;;  %s482_s16 = int_to_ptr.vmem [resolvable:$true] %s481_s16 }
  0x50   :  { %573 = vmatprep.subr.mxu1 %v811_v0  ;;  %604 = vmatprep.subr.mxu0 %v811_v0  ;;  %s776_s8 = scalar_lea.vmem %s482_s16, 128  ;;  %p781_p12 = scmp.lt.s32.totalorder %s482_s16, %s482_s16 }
  0x51   :  { %574 = vmatpush3.msra.mxu1 %v187_v12  ;;  %605 = vmatpush3.msra.mxu0 %v283_v31  ;;  %p777_p11 = scmp.ne.s32.totalorder %s482_s16, %s776_s8  ;;  %p782_p13 = scmp.lt.s32.totalorder %s776_s8, %s776_s8 }
  0x52   :  { %575 = vmatprep.subr.mxu1 %v811_v0  ;;  %606 = vmatprep.subr.mxu0 %v811_v0 }
  0x53   :  { %576 = vmatpush3.msra.mxu1 %v186_v13  ;;  %607 = vmatpush3.msra.mxu0 %v282_v32  ;;  %p783_p0 = por %p782_p13, %p781_p12 }
  0x54   :  { %577 = vmatprep.subr.mxu1 %v811_v0  ;;  %608 = vmatprep.subr.mxu0 %v811_v0 }
  0x55   :  { %578 = vmatpush3.msra.mxu1 %v185_v14  ;;  %609 = vmatpush3.msra.mxu0 %v281_v33  ;;  %p784_p1 = pnand %p783_p0, %p777_p11 }
  0x56   :  { %579 = vmatprep.subr.mxu1 %v811_v0  ;;  %610 = vmatprep.subr.mxu0 %v811_v0 }
  0x57   :  { %580 = vmatpush3.msra.mxu1 %v184_v15  ;;  %611 = vmatpush3.msra.mxu0 %v280_v34 }
  0x58   :  { %581 = vmatprep.subr.mxu1 %v811_v0  ;;  %612 = vmatprep.subr.mxu0 %v811_v0 }
  0x59   :  { %582 = vmatpush3.msra.mxu1 %v183_v16  ;;  %613 = vmatpush3.msra.mxu0 %v279_v35 }
  0x5a   :  { %583 = vmatprep.subr.mxu1 %v811_v0  ;;  %614 = vmatprep.subr.mxu0 %v811_v0 }
  0x5b   :  { %584 = vmatpush3.msra.mxu1 %v182_v17  ;;  %615 = vmatpush3.msra.mxu0 %v278_v36 }
  0x5c   :  { %585 = vmatprep.subr.mxu1 %v811_v0  ;;  %616 = vmatprep.subr.mxu0 %v811_v0 }
  0x5d   :  { %586 = vmatpush3.msra.mxu1 %v181_v18  ;;  %617 = vmatpush3.msra.mxu0 %v277_v37 }
  0x5e   :  { %625 = vmatprep.subr.mxu1 %v811_v0  ;;  %618 = vmatprep.subr.mxu0 %v811_v0 }
  0x5f   :  { %619 = vmatpush3.msra.mxu0 %v276_v38 }
  0x60   :  { %620 = vmatprep.subr.mxu0 %v811_v0 }
  0x61   :  { %621 = vmatpush3.msra.mxu0 %v275_v39 }
 0x100   :  { %v176_v27 = vpop.f32.mrf.mxu0 }
 0x101   :  { %v177_v28 = vadd.f32 %v492_v26, %v176_v27 }
 0x102   :  { %v554_v29 = vpop.f32.mrf.mxu0 }
 0x103   :  { %v180_v30 = vmax.f32 %v177_v28, 0.0 }
 0x105   :  { %588 = vmatmul.mubr.f32.vlgmr.msra.gmra.mxu1 %v180_v30 }
 0x106   :  { %657 = vmatprep.mubr.msk.f32.mxu1 %vm812_vm0, %v811_v0  ;;  %626 = vmatpush3.msra.mxu1 %v384_v40 }
 0x107   :  { %627 = vmatprep.subr.mxu1 %v811_v0 }
 0x108   :  { %628 = vmatpush3.msra.mxu1 %v383_v41 }
 0x109   :  { %629 = vmatprep.subr.mxu1 %v811_v0 }
 0x10a   :  { %630 = vmatpush3.msra.mxu1 %v382_v42 }
 0x10b   :  { %631 = vmatprep.subr.mxu1 %v811_v0 }
 0x10c   :  { %632 = vmatpush3.msra.mxu1 %v381_v43 }
 0x10d   :  { %633 = vmatprep.subr.mxu1 %v811_v0 }
 0x10e   :  { %634 = vmatpush3.msra.mxu1 %v380_v44 }
 0x10f   :  { %635 = vmatprep.subr.mxu1 %v811_v0 }
 0x110   :  { %636 = vmatpush3.msra.mxu1 %v379_v45 }
 0x111   :  { %637 = vmatprep.subr.mxu1 %v811_v0 }
 0x112   :  { %638 = vmatpush3.msra.mxu1 %v378_v46 }
 0x113   :  { %639 = vmatprep.subr.mxu1 %v811_v0 }
 0x114   :  { %640 = vmatpush3.msra.mxu1 %v377_v47 }
 0x115   :  { %641 = vmatprep.subr.mxu1 %v811_v0 }
 0x116   :  { %642 = vmatpush3.msra.mxu1 %v376_v48 }
 0x117   :  { %643 = vmatprep.subr.mxu1 %v811_v0 }
 0x118   :  { %644 = vmatpush3.msra.mxu1 %v375_v49 }
 0x119   :  { %645 = vmatprep.subr.mxu1 %v811_v0 }
 0x11a   :  { %646 = vmatpush3.msra.mxu1 %v374_v50 }
 0x11b   :  { %647 = vmatprep.subr.mxu1 %v811_v0 }
 0x11c   :  { %648 = vmatpush3.msra.mxu1 %v373_v51 }
 0x11d   :  { %649 = vmatprep.subr.mxu1 %v811_v0 }
 0x11e   :  { %650 = vmatpush3.msra.mxu1 %v372_v52 }
 0x11f   :  { %651 = vmatprep.subr.mxu1 %v811_v0 }
 0x120   :  { %652 = vmatpush3.msra.mxu1 %v371_v58 }
 0x121   :  { %653 = vmatprep.subr.mxu1 %v811_v0 }
 0x122   :  { %654 = vmatpush3.msra.mxu1 %v370_v59 }
 0x123   :  { %655 = vmatprep.subr.mxu1 %v811_v0 }
 0x124   :  { %656 = vmatpush3.msra.mxu1 %v369_v60 }
 0x1c5   :  { %v270_v54 = vpop.f32.mrf.mxu1 }
 0x1c6   :  { %v271_v55 = vadd.f32 %v494_v53, %v270_v54 }
 0x1c7   :  { %v589_v56 = vpop.f32.mrf.mxu1 }
 0x1c8   :  { %670 = vtanh.f32 %v271_v55 }
 0x1d5   :  { %v671_v57 = vpop.eup %670 }
 0x1d6   :  { %623 = vmatmul.mubr.f32.vlgmr.msra.gmra.mxu0 %v671_v57 }
 0x296   :  { %v364_v62 = vpop.f32.mrf.mxu0 }
 0x297   :  { %v365_v63 = vadd.f32 %v495_v61, %v364_v62 }
 0x298   :  { %v624_v1 = vpop.f32.mrf.mxu0 }
 0x299   :  { %v368_v2 = vmax.f32 %v365_v63, 0.0 }
 0x29b   :  { %658 = vmatmul.mubr.f32.vlgmr.msra.gmra.mxu1 %v368_v2 }
 0x35b   :  { %v458_v4 = vpop.f32.mrf.mxu1 }
 0x35c   :  { %v459_v5 = vadd.f32 %v496_v3, %v458_v4 }
 0x35d   :  { %v659_v6 = vpop.f32.mrf.mxu1 }
 0x35e   :  { %462 = vmax.xlane.f32.xlu0 %v459_v5 }
 0x3e7   :  { %v463_v0 = vpop.xlane.xlu0 %462 }
 0x3e8   :  { %v464_v7 = vsub.f32 %v459_v5, %v463_v0 }
 0x3ea   :  { %v465_v8 = vmul.f32 1.442695, %v464_v7 }
 0x3ec   :  { %672 = vpow2.f32 %v465_v8 }
 0x3f9   :  { %v673_v9 = vpop.eup %672 }
 0x3fa   :  { %467 = vadd.xlane.f32.xlu0 %v673_v9 }
 0x483   :  { %v468_v10 = vpop.xlane.xlu0 %467 }
 0x484   :  { %674 = vrcp.f32 %v468_v10 }
 0x491   :  { %v675_v11 = vpop.eup %674 }
 0x492   :  { %v470_v12 = vmul.f32 %v675_v11, %v468_v10 }
 0x494   :  { %v471_v13 = vsub.f32 2.0, %v470_v12 }
 0x496   :  { %v472_v14 = vmul.f32 %v675_v11, %v471_v13 }
 0x498   :  { %v473_v15 = vmul.f32 %v673_v9, %v472_v14 }
 0x49a   :  { %474 = vst [vmem:[#allocation11] sm:$0xff] %v473_v15 }
 0x49b   :  { %787 = shalt.err (!%p784_p1)
}
 0x49c   :  { %484 = dma.vmem_to_hbm [thread:$0]  %s482_s16, 128, %s969_s9, [#allocation4]  }
 0x49d   :  { %802 = dma.done.wait [#allocation4], 128  }
 0x49e   :  { %803 = vsyncadd [#allocation4], 4294967168 }
 0x49f   :  { %488 = vsyncpa [#allocation3], 1 }
 0x4a0   :  { %489 = vsyncpa [#allocation6], 1 }
 0x4a1   :  { %490 = vsyncpa [#allocation9], 1 }
 0x4a2   :  { %491 = vsyncpa [#allocation4], 1 }

</bundles_post_ra>
